<compile_context>
chip_gen: v5e
topology: v5e:2x2
jax: 0.10.0
libtpu: 0.0.40
codegen_flags: <defaults>
</compile_context>

<pallas_src>
import jax
import jax.numpy as jnp
from jax import lax
from jax.experimental import pallas as pl
from jax.experimental.pallas import tpu as pltpu

# ----------------------- problem sizes (small, consistent with the module) ---
B = 2            # batch
H = 16           # height
W = 16           # width
HW = H * W       # pixels per image
N = B * HW       # fused pixel axis: both batches on one 512-lane axis
LABEL_NC = 4     # opt.label_nc, contain_dontcare_label=False
NO_INSTANCE = False
C_IN = LABEL_NC + (0 if NO_INSTANCE else 1)   # semantics channels (one-hot + edge)
C_HID = 32       # stand-in generator hidden width (ngf)
C_OUT = 3        # RGB fake image

P_ROWS = C_HID + C_OUT        # packed-parameter slab rows
P_COLS = C_HID + 1            # packed-parameter slab cols (bias in last column)

assert W & (W - 1) == 0 and HW & (HW - 1) == 0, "iota masks assume power-of-two sizes"


# ------------------------------ edge map (get_edges) --------------------------
def _edges_fused(inst):
    """get_edges() on the batch-fused (1, B*HW) instance map.

    Only the instance map is rotated (XLU slot); neighbour validity is decided
    by static iota masks: column tests for the horizontal directions and
    within-image row tests for the vertical ones.  The (pix & (HW-1)) masks also
    prevent row 0 of batch b from being compared against the last row of batch
    b-1 across the fused batch seam.
    """
    pix = lax.broadcasted_iota(jnp.int32, (1, N), 1)
    col = pix & (W - 1)          # column within a row
    pos = pix & (HW - 1)         # pixel position within its own image
    edge = jnp.zeros((1, N), dtype=jnp.bool_)
    neighbours = (
        (1,     col != 0),           # left  neighbour: inst[p-1]
        (N - 1, col != W - 1),       # right neighbour: inst[p+1]
        (W,     pos >= W),           # above neighbour: inst[p-W]
        (N - W, pos < HW - W),       # below neighbour: inst[p+W]
    )
    for shift, valid in neighbours:
        nb = pltpu.roll(inst, shift=shift, axis=1)
        edge = jnp.logical_or(edge, jnp.logical_and(inst != nb, valid))
    return edge.astype(jnp.float32)                   # (1, N)


# ------------------------------- kernel --------------------------------------
def pix2pix_kernel(maps_ref, params_ref, out_ref):
    # maps_ref   : (2, N) int32    row 0 = label map, row 1 = instance map
    # params_ref : (P_ROWS, P_COLS) f32 packed slab
    #                [0:C_HID, 0:C_IN]  = w1t (C_HID, C_IN)
    #                [0:C_HID, C_HID]   = b1  (C_HID,)
    #                [C_HID:,  0:C_HID] = w2t (C_OUT, C_HID)
    #                [C_HID:,  C_HID]   = b2  (C_OUT,)
    # out_ref    : (B, C_OUT, HW) f32 lane-dense fake image
    label = maps_ref[0:1, :]                                    # (1, N)
    inst = maps_ref[1:2, :]                                     # (1, N)

    w1t = params_ref[0:C_HID, 0:C_IN]                           # (C_HID, C_IN)
    b1 = params_ref[0:C_HID, C_HID:C_HID + 1]                   # (C_HID, 1)
    w2t = params_ref[C_HID:C_HID + C_OUT, 0:C_HID]              # (C_OUT, C_HID)
    b2 = params_ref[C_HID:C_HID + C_OUT, C_HID:C_HID + 1]       # (C_OUT, 1)

    # layer 1 (1x1 conv on one-hot(label) [+ edge channel]) -------------------
    # one_hot(label) @ w1 is an exclusive row select of w1, so fold the bias
    # into the tiny (C_HID, LABEL_NC) column block once and pick the column
    # with a select chain (no (C_HID, N) zeros, no standalone bias add).
    # NOTE: labels are assumed in [0, LABEL_NC), same as scatter_ requires.
    cols = w1t[:, :LABEL_NC] + b1                               # (C_HID, LABEL_NC)
    acc = cols[:, 0:1]                                          # seed: class 0
    for c in range(1, LABEL_NC):
        acc = jnp.where(label == c, cols[:, c:c + 1], acc)      # (C_HID, N)
    if not NO_INSTANCE:
        edge = _edges_fused(inst)                               # (1, N)
        acc = acc + edge * w1t[:, LABEL_NC:LABEL_NC + 1]        # one FMA
    h1 = jnp.maximum(acc, 0.0)                                  # ReLU, (C_HID, N)

    # layer 2 (1x1 conv) + tanh ------------------------------------------------
    # bf16 operands + f32 accumulation: single-pass MXU on all generations.
    y = jnp.dot(w2t.astype(jnp.bfloat16), h1.astype(jnp.bfloat16),
                preferred_element_type=jnp.float32) + b2        # (C_OUT, N)
    y = jnp.tanh(y)

    # two 256-lane-aligned slices of the fused result: aligned views, stores
    # are lane-dense (HW = 256 lanes).
    for b in range(B):
        out_ref[b] = y[:, b * HW:(b + 1) * HW]                  # (C_OUT, HW)


# ------------------------------- wrapper --------------------------------------
@jax.jit
def pix2pix_inference(label_nchw, inst_nchw, w1, b1, w2, b2):
    """label/inst: (B,1,H,W) integer NCHW maps (PyTorch convention).
    Weights follow the PyTorch-style layout: w1 (C_IN, C_HID), b1 (1, C_HID),
    w2 (C_HID, C_OUT), b2 (1, C_OUT).  Returns the fake image (B, C_OUT, H, W)."""
    # one (2, B*HW) int32 input instead of two separate maps: fewer prologue DMAs
    maps = jnp.stack([label_nchw.reshape(B, HW),
                      inst_nchw.reshape(B, HW)]).astype(jnp.int32).reshape(2, N)

    # pack the four tiny parameter tensors into one f32 slab (one DMA)
    params = jnp.zeros((P_ROWS, P_COLS), jnp.float32)
    params = params.at[:C_HID, :C_IN].set(w1.T)
    params = params.at[:C_HID, C_HID].set(b1.reshape(C_HID))
    params = params.at[C_HID:, :C_HID].set(w2.T)
    params = params.at[C_HID:, C_HID].set(b2.reshape(C_OUT))

    vmem = pltpu.MemorySpace.VMEM
    out_flat = pl.pallas_call(
        pix2pix_kernel,
        out_shape=jax.ShapeDtypeStruct((B, C_OUT, HW), jnp.float32),
        # single invocation: the whole problem is a few hundred KiB of VMEM, so
        # a grid would only add per-step overhead.
        # TODO(synk): add a "parallel" grid axis + dimension_semantics once the
        # real SPADE generator lands (v7x has 2 TensorCores per chip).
        in_specs=[pl.BlockSpec(memory_space=vmem),
                  pl.BlockSpec(memory_space=vmem)],
        out_specs=pl.BlockSpec(memory_space=vmem),
    )(maps, params)

    # (B, C_OUT, H*W) -> (B, C_OUT, H, W): contiguous reshape, no transpose.
    return out_flat.reshape(B, C_OUT, H, W)


# ------------------------- pure-JAX reference (for checking) ------------------
def _reference_forward(label_nchw, inst_nchw, w1, b1, w2, b2):
    """Mirror of preprocess_input + the stand-in netG, in plain JAX."""
    lab = label_nchw[:, 0].astype(jnp.int32)                        # (B, H, W)
    onehot = jax.nn.one_hot(lab, LABEL_NC, dtype=jnp.float32)       # (B, H, W, NC)
    inst = inst_nchw[:, 0]
    e = jnp.zeros((B, H, W), dtype=jnp.bool_)
    dw = inst[:, :, 1:] != inst[:, :, :-1]
    e = e.at[:, :, 1:].set(e[:, :, 1:] | dw)
    e = e.at[:, :, :-1].set(e[:, :, :-1] | dw)
    dh = inst[:, 1:, :] != inst[:, :-1, :]
    e = e.at[:, 1:, :].set(e[:, 1:, :] | dh)
    e = e.at[:, :-1, :].set(e[:, :-1, :] | dh)
    sem = jnp.concatenate([onehot, e[..., None].astype(jnp.float32)], axis=-1)
    x = sem.reshape(B * H * W, C_IN)
    h = jnp.maximum(jnp.dot(x, w1, precision="highest") + b1.reshape(1, C_HID), 0.0)
    y = jnp.tanh(jnp.dot(h, w2, precision="highest") + b2.reshape(1, C_OUT))
    return jnp.transpose(y.reshape(B, H, W, C_OUT), (0, 3, 1, 2))


# ------------------------------- main -----------------------------------------
if __name__ == "__main__":
    key = jax.random.PRNGKey(0)
    k_lab, k_inst, k_w1, k_b1, k_w2, k_b2 = jax.random.split(key, 6)

    # data['label'] / data['instance'] : NCHW integer maps
    label_nchw = jax.random.randint(k_lab, (B, 1, H, W), 0, LABEL_NC, dtype=jnp.int32)
    inst_nchw = jax.random.randint(k_inst, (B, 1, H, W), 0, 6, dtype=jnp.int32)

    # deterministic stand-in generator parameters (PyTorch-style layouts)
    w1 = (0.1 * jax.random.normal(k_w1, (C_IN, C_HID))).astype(jnp.float32)
    b1 = (0.1 * jax.random.normal(k_b1, (1, C_HID))).astype(jnp.float32)
    w2 = (0.1 * jax.random.normal(k_w2, (C_HID, C_OUT))).astype(jnp.float32)
    b2 = (0.1 * jax.random.normal(k_b2, (1, C_OUT))).astype(jnp.float32)

    fake_image = pix2pix_inference(label_nchw, inst_nchw, w1, b1, w2, b2)
    fake_image = jax.block_until_ready(fake_image)

    assert fake_image.shape == (B, C_OUT, H, W)
    assert bool(jnp.all(jnp.isfinite(fake_image)))

    # numerical check against the pure-JAX reference of the same forward pass
    ref = _reference_forward(label_nchw, inst_nchw, w1, b1, w2, b2)
    assert bool(jnp.allclose(fake_image, ref, rtol=1e-2, atol=1e-2))

    print("KERNEL_OK")
</pallas_src>

<mosaic_0001>
module attributes {stable_mosaic.version = 11 : i64} {
  func.func @pix2pix_kernel(%arg0: memref<2x512xi32, #tpu.memory_space<vmem>>, %arg1: memref<35x33xf32, #tpu.memory_space<vmem>>, %arg2: memref<2x3x256xf32, #tpu.memory_space<vmem>>) attributes {dimension_semantics = [], scalar_prefetch = 0 : i64, scratch_operands = 0 : i64, tpu.core_type = #tpu.core_type<tc>} {
    %c0 = arith.constant 0 : index
    %c0_0 = arith.constant 0 : index
    %0 = vector.load %arg0[%c0, %c0_0] : memref<2x512xi32, #tpu.memory_space<vmem>>, vector<1x512xi32>
    %c1 = arith.constant 1 : index
    %c0_1 = arith.constant 0 : index
    %1 = vector.load %arg0[%c1, %c0_1] : memref<2x512xi32, #tpu.memory_space<vmem>>, vector<1x512xi32>
    %c0_2 = arith.constant 0 : index
    %c0_3 = arith.constant 0 : index
    %2 = vector.load %arg1[%c0_2, %c0_3] : memref<35x33xf32, #tpu.memory_space<vmem>>, vector<32x5xf32>
    %c0_4 = arith.constant 0 : index
    %c32 = arith.constant 32 : index
    %3 = vector.load %arg1[%c0_4, %c32] : memref<35x33xf32, #tpu.memory_space<vmem>>, vector<32x1xf32>
    %c32_5 = arith.constant 32 : index
    %c0_6 = arith.constant 0 : index
    %4 = vector.load %arg1[%c32_5, %c0_6] : memref<35x33xf32, #tpu.memory_space<vmem>>, vector<3x32xf32>
    %c32_7 = arith.constant 32 : index
    %c32_8 = arith.constant 32 : index
    %5 = vector.load %arg1[%c32_7, %c32_8] : memref<35x33xf32, #tpu.memory_space<vmem>>, vector<3x1xf32>
    %6 = vector.extract_strided_slice %2 {offsets = [0, 0], sizes = [32, 4], strides = [1, 1]} : vector<32x5xf32> to vector<32x4xf32>
    %7 = vector.broadcast %3 : vector<32x1xf32> to vector<32x4xf32>
    %8 = arith.addf %6, %7 : vector<32x4xf32>
    %9 = vector.extract_strided_slice %8 {offsets = [0, 0], sizes = [32, 1], strides = [1, 1]} : vector<32x4xf32> to vector<32x1xf32>
    %c1_i32 = arith.constant 1 : i32
    %10 = vector.broadcast %c1_i32 : i32 to vector<1x512xi32>
    %11 = arith.cmpi eq, %0, %10 : vector<1x512xi32>
    %12 = vector.extract_strided_slice %8 {offsets = [0, 1], sizes = [32, 1], strides = [1, 1]} : vector<32x4xf32> to vector<32x1xf32>
    %13 = vector.shape_cast %11 : vector<1x512xi1> to vector<1x512xi1>
    %14 = vector.broadcast %13 : vector<1x512xi1> to vector<32x512xi1>
    %15 = vector.shape_cast %12 : vector<32x1xf32> to vector<32x1xf32>
    %16 = vector.broadcast %15 : vector<32x1xf32> to vector<32x512xf32>
    %17 = vector.shape_cast %9 : vector<32x1xf32> to vector<32x1xf32>
    %18 = vector.broadcast %17 : vector<32x1xf32> to vector<32x512xf32>
    %19 = arith.select %14, %16, %18 : vector<32x512xi1>, vector<32x512xf32>
    %c2_i32 = arith.constant 2 : i32
    %20 = vector.broadcast %c2_i32 : i32 to vector<1x512xi32>
    %21 = arith.cmpi eq, %0, %20 : vector<1x512xi32>
    %22 = vector.extract_strided_slice %8 {offsets = [0, 2], sizes = [32, 1], strides = [1, 1]} : vector<32x4xf32> to vector<32x1xf32>
    %23 = vector.shape_cast %21 : vector<1x512xi1> to vector<1x512xi1>
    %24 = vector.broadcast %23 : vector<1x512xi1> to vector<32x512xi1>
    %25 = vector.shape_cast %22 : vector<32x1xf32> to vector<32x1xf32>
    %26 = vector.broadcast %25 : vector<32x1xf32> to vector<32x512xf32>
    %27 = arith.select %24, %26, %19 : vector<32x512xi1>, vector<32x512xf32>
    %c3_i32 = arith.constant 3 : i32
    %28 = vector.broadcast %c3_i32 : i32 to vector<1x512xi32>
    %29 = arith.cmpi eq, %0, %28 : vector<1x512xi32>
    %30 = vector.extract_strided_slice %8 {offsets = [0, 3], sizes = [32, 1], strides = [1, 1]} : vector<32x4xf32> to vector<32x1xf32>
    %31 = vector.shape_cast %29 : vector<1x512xi1> to vector<1x512xi1>
    %32 = vector.broadcast %31 : vector<1x512xi1> to vector<32x512xi1>
    %33 = vector.shape_cast %30 : vector<32x1xf32> to vector<32x1xf32>
    %34 = vector.broadcast %33 : vector<32x1xf32> to vector<32x512xf32>
    %35 = arith.select %32, %34, %27 : vector<32x512xi1>, vector<32x512xf32>
    %36 = tpu.iota {dimensions = array<i32: 1>} : vector<1x512xi32>
    %c15_i32 = arith.constant 15 : i32
    %37 = vector.broadcast %c15_i32 : i32 to vector<1x512xi32>
    %38 = arith.andi %36, %37 : vector<1x512xi32>
    %c255_i32 = arith.constant 255 : i32
    %39 = vector.broadcast %c255_i32 : i32 to vector<1x512xi32>
    %40 = arith.andi %36, %39 : vector<1x512xi32>
    %false = arith.constant false
    %41 = vector.broadcast %false : i1 to vector<1x512xi1>
    %c0_i32 = arith.constant 0 : i32
    %42 = vector.broadcast %c0_i32 : i32 to vector<1x512xi32>
    %43 = arith.cmpi ne, %38, %42 : vector<1x512xi32>
    %c15_i32_9 = arith.constant 15 : i32
    %44 = vector.broadcast %c15_i32_9 : i32 to vector<1x512xi32>
    %45 = arith.cmpi ne, %38, %44 : vector<1x512xi32>
    %c16_i32 = arith.constant 16 : i32
    %46 = vector.broadcast %c16_i32 : i32 to vector<1x512xi32>
    %47 = arith.cmpi sge, %40, %46 : vector<1x512xi32>
    %c240_i32 = arith.constant 240 : i32
    %48 = vector.broadcast %c240_i32 : i32 to vector<1x512xi32>
    %49 = arith.cmpi slt, %40, %48 : vector<1x512xi32>
    %c1_i32_10 = arith.constant 1 : i32
    %50 = tpu.dynamic_rotate %1 by %c1_i32_10 dim 1 : vector<1x512xi32>, i32 -> vector<1x512xi32>
    %51 = arith.cmpi ne, %1, %50 : vector<1x512xi32>
    %52 = arith.andi %51, %43 : vector<1x512xi1>
    %53 = arith.ori %41, %52 : vector<1x512xi1>
    %c511_i32 = arith.constant 511 : i32
    %54 = tpu.dynamic_rotate %1 by %c511_i32 dim 1 : vector<1x512xi32>, i32 -> vector<1x512xi32>
    %55 = arith.cmpi ne, %1, %54 : vector<1x512xi32>
    %56 = arith.andi %55, %45 : vector<1x512xi1>
    %57 = arith.ori %53, %56 : vector<1x512xi1>
    %c16_i32_11 = arith.constant 16 : i32
    %58 = tpu.dynamic_rotate %1 by %c16_i32_11 dim 1 : vector<1x512xi32>, i32 -> vector<1x512xi32>
    %59 = arith.cmpi ne, %1, %58 : vector<1x512xi32>
    %60 = arith.andi %59, %47 : vector<1x512xi1>
    %61 = arith.ori %57, %60 : vector<1x512xi1>
    %c496_i32 = arith.constant 496 : i32
    %62 = tpu.dynamic_rotate %1 by %c496_i32 dim 1 : vector<1x512xi32>, i32 -> vector<1x512xi32>
    %63 = arith.cmpi ne, %1, %62 : vector<1x512xi32>
    %64 = arith.andi %63, %49 : vector<1x512xi1>
    %65 = arith.ori %61, %64 : vector<1x512xi1>
    %66 = arith.extui %65 : vector<1x512xi1> to vector<1x512xi32>
    %67 = arith.sitofp %66 : vector<1x512xi32> to vector<1x512xf32>
    %68 = vector.extract_strided_slice %2 {offsets = [0, 4], sizes = [32, 1], strides = [1, 1]} : vector<32x5xf32> to vector<32x1xf32>
    %69 = vector.broadcast %67 : vector<1x512xf32> to vector<32x512xf32>
    %70 = vector.broadcast %68 : vector<32x1xf32> to vector<32x512xf32>
    %71 = arith.mulf %69, %70 : vector<32x512xf32>
    %72 = arith.addf %35, %71 : vector<32x512xf32>
    %cst = arith.constant 0.000000e+00 : f32
    %73 = vector.broadcast %cst : f32 to vector<32x512xf32>
    %74 = arith.maximumf %72, %73 : vector<32x512xf32>
    %75 = arith.truncf %4 : vector<3x32xf32> to vector<3x32xbf16>
    %76 = arith.truncf %74 : vector<32x512xf32> to vector<32x512xbf16>
    %cst_12 = arith.constant dense<0.000000e+00> : vector<3x512xf32>
    %77 = tpu.matmul %75, %76, %cst_12 {dimension_numbers = #tpu.dot_dimension_numbers<[1], [0], [0], [1], [0, 0, 1, 1], [], []>} : vector<3x32xbf16>, vector<32x512xbf16>, vector<3x512xf32> -> vector<3x512xf32>
    %78 = vector.broadcast %5 : vector<3x1xf32> to vector<3x512xf32>
    %79 = arith.addf %77, %78 : vector<3x512xf32>
    %80 = math.tanh %79 : vector<3x512xf32>
    %81 = vector.extract_strided_slice %80 {offsets = [0, 0], sizes = [3, 256], strides = [1, 1]} : vector<3x512xf32> to vector<3x256xf32>
    %c0_13 = arith.constant 0 : index
    %c0_14 = arith.constant 0 : index
    %c0_15 = arith.constant 0 : index
    %82 = vector.load %arg2[%c0_13, %c0_14, %c0_15] : memref<2x3x256xf32, #tpu.memory_space<vmem>>, vector<1x3x256xf32>
    %83 = vector.shape_cast %82 : vector<1x3x256xf32> to vector<3x256xf32>
    %84 = vector.shape_cast %81 : vector<3x256xf32> to vector<1x3x256xf32>
    tpu.vector_store %arg2[%c0_13, %c0_14, %c0_15], %84 {strides = array<i32>} : memref<2x3x256xf32, #tpu.memory_space<vmem>>, vector<1x3x256xf32>,
    %85 = vector.extract_strided_slice %80 {offsets = [0, 256], sizes = [3, 256], strides = [1, 1]} : vector<3x512xf32> to vector<3x256xf32>
    %c1_16 = arith.constant 1 : index
    %c0_17 = arith.constant 0 : index
    %c0_18 = arith.constant 0 : index
    %86 = vector.load %arg2[%c1_16, %c0_17, %c0_18] : memref<2x3x256xf32, #tpu.memory_space<vmem>>, vector<1x3x256xf32>
    %87 = vector.shape_cast %86 : vector<1x3x256xf32> to vector<3x256xf32>
    %88 = vector.shape_cast %85 : vector<3x256xf32> to vector<1x3x256xf32>
    tpu.vector_store %arg2[%c1_16, %c0_17, %c0_18], %88 {strides = array<i32>} : memref<2x3x256xf32, #tpu.memory_space<vmem>>, vector<1x3x256xf32>,
    return
  }
}

</mosaic_0001>

<bundles_post_ra>
// kernel: pix2pix_inference.1
= control target key start
LH: loop header
LB: loop body
LE: loop exit
PB: predicated region body
PF: predicated region fallthrough
CT: control target
= control target key end

     0   :  { %v573_v0 = vmov 32   ;;  %s574_s15 = smov 1   ;;  %v575_v10 = vmov 4   ;;  %s576_s20 = smov 127   ;;  %v579_v11 = vmov 1   ;;  %v580_v12 = vmov 0   ;;  %s981_s1 = inlined_call_operand.vmem [shape: f32[35,33], index: 1, kind: input, shape index: {}]   ;;  %s982_s0 = inlined_call_operand.vmem [shape: s32[2,512], index: 0, kind: input, shape index: {}]   ;;  %s983_s2 = inlined_call_operand.vmem [shape: f32[2,3,256], index: 2, kind: output, shape index: {}]  }
   0x1   :  { %542 = vset.pattern.permute.xlu0 %v573_v0  ;;  %v17_v1 = vld [vmem:[%s981_s1 + $0x10] sm:$0xff]  ;;  %543 = vset.pattern.permute.xlu1 %v573_v0  ;;  %v607_v2 = vld [vmem:[%s981_s1] sm:$0xff]  ;;  %v18_v5 = vld [vmem:[%s981_s1 + $0x18] sm:$0xff]  ;;  %s577_s21 = smov 16   ;;  %s578_s22 = smov 112   ;;  %v581_v18 = vmov 2   ;;  %v190_v28 = vlaneseq }
   0x2   :  { %32 = vperm.xlu0 %542, %v17_v1   ;;  %22 = vperm.xlu1 %543, %v607_v2   ;;  %v613_v3 = vld [vmem:[%s982_s0 + $0x1] ss:$2 sm:$0xf]  ;;  %v16_v6 = vld [vmem:[%s981_s1 + $0x8] sm:$0xff]  ;;  %v582_v21 = vmov 3   ;;  %vm239_vm8 = vcmask 1040384  }
   0x3   :  { %v219_v4 = vperm.slane %v613_v3, 0  ;;  %v220_v7 = vperm.slane %v613_v3, 1  ;;  %v222_v8 = vperm.slane %v613_v3, 3  ;;  %v221_v9 = vperm.slane %v613_v3, 2  ;;  %546 = vset.pattern.permute.xlu2 %v579_v11 }
   0x4   :  { %v643_v29 = vand.u32 127, %v190_v28  ;;  %vm241_vm9 = vcmask 1042434   ;;  %v675_v54 = vrot.slane %v579_v11, 7  ;;  %v678_v55 = vrot.slane %v579_v11, 5 }
   0x5   :  { %223 = vrot.lane.b32.xlu2 %v219_v4, %s574_s15  ;;  %vm243_vm12 = vcmask 1041408  }
   0x6   :  { %v648_v32 = vadd.s32 128, %v643_v29  ;;  %v193_v34 = vadd.s32 256, %v643_v29  ;;  %v652_v35 = vadd.s32 384, %v643_v29  ;;  %v195_v41 = vand.u32 15, %v643_v29 }
   0x7   :  { %vm231_vm3 = vcmp.lt.s32.totalorder %v643_v29, 1  ;;  %vm266_vm11 = vcmp.lt.s32.totalorder %v643_v29, 127  ;;  %vm299_vm14 = vcmp.lt.s32.totalorder %v643_v29, 16 }
   0x8   :  { %v196_v36 = vand.u32 15, %v648_v32  ;;  %v197_v37 = vand.u32 15, %v193_v34  ;;  %v198_v38 = vand.u32 15, %v652_v35  ;;  %vm203_vm4 = vcmp.ne.s32.totalorder %v195_v41, 0 }
   0x9   :  { %v246_v48 = vsel %vm203_vm4, 1, %v580_v12  ;;  %vm207_vm10 = vcmp.ne.s32.totalorder %v195_v41, 15  ;;  %v201_v58 = vand.u32 255, %v193_v34 }
   0xa   :  { %37 = vperm.xlu0 %542, %v18_v5   ;;  %27 = vperm.xlu1 %543, %v16_v6   ;;  %vm204_vm0 = vcmp.ne.s32.totalorder %v196_v36, 0  ;;  %vm205_vm1 = vcmp.ne.s32.totalorder %v197_v37, 0  ;;  %vm206_vm2 = vcmp.ne.s32.totalorder %v198_v38, 0  ;;  %vm208_vm5 = vcmp.ne.s32.totalorder %v196_v36, 15 }
   0xb   :  { %v247_v43 = vsel %vm204_vm0, 1, %v580_v12  ;;  %v248_v44 = vsel %vm205_vm1, 1, %v580_v12  ;;  %v249_v45 = vsel %vm206_vm2, 1, %v580_v12  ;;  %vm209_vm6 = vcmp.ne.s32.totalorder %v197_v37, 15 }
   0xc   :  { %vm210_vm7 = vcmp.ne.s32.totalorder %v198_v38, 15  ;;  %v250_v46 = vrot.slane %v247_v43, 7  ;;  %v251_v49 = vrot.slane %v248_v44, 6  ;;  %v252_v50 = vrot.slane %v249_v45, 5 }
   0xd   :  { %225 = vrot.lane.b32.xlu2 %v220_v7, %s574_s15  ;;  %v279_v51 = vsel %vm208_vm5, 1, %v580_v12  ;;  %v280_v52 = vsel %vm209_vm6, 1, %v580_v12  ;;  %v281_v53 = vsel %vm210_vm7, 1, %v580_v12  ;;  %v278_v63 = vsel %vm207_vm10, 1, %v580_v12 }
   0xe   :  { %v253_v59 = vsel %vm239_vm8, %v246_v48, %v250_v46  ;;  %v282_v61 = vrot.slane %v279_v51, 7  ;;  %v254_v62 = vsel %vm241_vm9, %v251_v49, %v252_v50  ;;  %vm213_vm13 = vcmp.ge.s32.totalorder %v201_v58, 16 }
   0xf   :  { %vm332_vm2 = vcmp.lt.s32.totalorder %v643_v29, 112  ;;  %v349_v51 = vrot.slane %v579_v11, 6 }
  0x12   :  { %229 = vrot.lane.b32.xlu1 %v222_v8, %s574_s15  ;;  %227 = vrot.lane.b32.xlu0 %v221_v9, %s574_s15 }
  0x13   :  { %544 = vset.pattern.permute.xlu0 %v575_v10  ;;  %545 = vset.pattern.permute.xlu1 %v575_v10 }
  0x15   :  { %258 = vrot.lane.b32.xlu2 %v219_v4, %s576_s20 }
  0x1a   :  { %262 = vrot.lane.b32.xlu1 %v221_v9, %s576_s20  ;;  %260 = vrot.lane.b32.xlu0 %v220_v7, %s576_s20 }
  0x1d   :  { %264 = vrot.lane.b32.xlu2 %v222_v8, %s576_s20 }
  0x22   :  { %293 = vrot.lane.b32.xlu1 %v220_v7, %s577_s21  ;;  %291 = vrot.lane.b32.xlu0 %v219_v4, %s577_s21 }
  0x25   :  { %295 = vrot.lane.b32.xlu2 %v221_v9, %s577_s21 }
  0x2a   :  { %324 = vrot.lane.b32.xlu1 %v219_v4, %s578_s22  ;;  %297 = vrot.lane.b32.xlu0 %v222_v8, %s577_s21 }
  0x2d   :  { %326 = vrot.lane.b32.xlu2 %v220_v7, %s578_s22 }
  0x32   :  { %330 = vrot.lane.b32.xlu1 %v222_v8, %s578_s22  ;;  %328 = vrot.lane.b32.xlu0 %v221_v9, %s578_s22 }
  0x3a   :  { %381 = vperm.xlu1 %545, %v18_v5   ;;  %377 = vperm.xlu0 %544, %v17_v1  }
  0x42   :  { %548 = vset.pattern.permute.xlu1 %v580_v12  ;;  %547 = vset.pattern.permute.xlu0 %v579_v11 }
  0x5f   :  { %v632_v23 = vpop.permute.xlu2 %223 }
  0x67   :  { %v636_v24 = vpop.permute.xlu2 %225 }
  0x68   :  { %v234_v47 = vsel %vm231_vm3, %v632_v23, %v636_v24 }
  0x69   :  { %v236_v60 = vrot.slane %v234_v47, 7 }
  0x6f   :  { %v641_v27 = vpop.permute.xlu2 %258 }
  0x74   :  { %v33_v13 = vpop.permute.xlu0 %32  ;;  %v23_v15 = vpop.permute.xlu1 %22 }
  0x75   :  { %v42_v14 = vadd.f32 %v33_v13, %v17_v1  ;;  %v40_v22 = vadd.f32 %v23_v15, %v607_v2  ;;  %v284_v1 = vrot.slane %v281_v53, 5  ;;  %v255_v13 = vsel %vm243_vm12, %v253_v59, %v254_v62 }
  0x76   :  { %v202_v15 = vand.u32 255, %v652_v35 }
  0x77   :  { %83 = vperm.xlu1 %548, %v42_v14   ;;  %66 = vperm.xlu2 %546, %v42_v14   ;;  %v265_v33 = vpop.permute.xlu2 %264 }
  0x78   :  { %vm218_vm1 = vcmp.lt.s32.totalorder %v202_v15, 240 }
  0x79   :  { %v347_v44 = vsel %vm218_vm1, 1, %v580_v12 }
  0x7a   :  { %v350_v58 = vrot.slane %v347_v44, 5 }
  0x7c   :  { %v38_v16 = vpop.permute.xlu0 %37  ;;  %v28_v19 = vpop.permute.xlu1 %27 }
  0x7d   :  { %v43_v17 = vadd.f32 %v38_v16, %v18_v5  ;;  %v41_v20 = vadd.f32 %v28_v19, %v16_v6  ;;  %v270_v5 = vsel %vm266_vm11, %v265_v33, %v641_v27 }
  0x7e   :  { %v273_v19 = vrot.slane %v270_v5, 5 }
  0x7f   :  { %550 = vset.pattern.permute.xlu1 %v581_v18  ;;  %71 = vperm.xlu0 %547, %v43_v17   ;;  %v296_v42 = vpop.permute.xlu2 %295 }
  0x80   :  { %549 = vset.pattern.permute.xlu2 %v580_v12  ;;  %125 = vperm.xlu1 %550, %v42_v14  }
  0x81   :  { %87 = vperm.xlu2 %549, %v43_v17  }
  0x84   :  { %v639_v25 = vpop.permute.xlu1 %229  ;;  %v228_v26 = vpop.permute.xlu0 %227 }
  0x85   :  { %v233_v4 = vsel %vm231_vm3, %v636_v24, %v228_v26  ;;  %v235_v16 = vsel %vm231_vm3, %v639_v25, %v632_v23 }
  0x87   :  { %61 = vperm.xlu0 %547, %v41_v20   ;;  %v327_v7 = vpop.permute.xlu2 %326 }
  0x88   :  { %553 = vset.pattern.permute.xlu1 %v582_v21 }
  0x89   :  { %551 = vset.pattern.permute.xlu2 %v581_v18  ;;  %171 = vperm.xlu1 %553, %v43_v17  }
  0x8a   :  { %129 = vperm.xlu2 %551, %v43_v17  }
  0x8c   :  { %v263_v30 = vpop.permute.xlu1 %262  ;;  %v645_v31 = vpop.permute.xlu0 %260 }
  0x8d   :  { %v268_v8 = vsel %vm266_vm11, %v645_v31, %v263_v30  ;;  %v267_v9 = vsel %vm266_vm11, %v263_v30, %v265_v33  ;;  %v269_v24 = vsel %vm266_vm11, %v641_v27, %v645_v31 }
  0x8f   :  { %555 = vset.pattern.permute.xlu0 %v575_v10 }
  0x90   :  { %369 = vperm.xlu0 %555, %v607_v2   ;;  %v232_v2 = vsel %vm231_vm3, %v228_v26, %v639_v25  ;;  %v240_v25 = vsel %vm239_vm8, %v235_v16, %v236_v60  ;;  %vm256_vm3 = vcmp.ne.s32.totalorder %v255_v13, 0 }
  0x91   :  { %556 = vset.pattern.permute.xlu1 %v575_v10  ;;  %v200_v10 = vand.u32 255, %v648_v32  ;;  %v238_v17 = vrot.slane %v232_v2, 5  ;;  %v352_v2 = vsel %vm241_vm9, %v349_v51, %v350_v58 }
  0x92   :  { %552 = vset.pattern.permute.xlu2 %v582_v21  ;;  %373 = vperm.xlu1 %556, %v16_v6   ;;  %v199_v6 = vand.u32 255, %v643_v29 }
  0x93   :  { %167 = vperm.xlu2 %552, %v42_v14   ;;  %v285_v14 = vsel %vm239_vm8, %v278_v63, %v282_v61  ;;  %vm216_vm0 = vcmp.lt.s32.totalorder %v200_v10, 240 }
  0x94   :  { %v656_v39 = vpop.permute.xlu1 %293  ;;  %v658_v40 = vpop.permute.xlu0 %291  ;;  %vm211_vm15 = vcmp.ge.s32.totalorder %v199_v6, 16  ;;  %v345_v38 = vsel %vm216_vm0, 1, %v580_v12 }
  0x95   :  { %v302_v26 = vsel %vm299_vm14, %v658_v40, %v656_v39  ;;  %v301_v30 = vsel %vm299_vm14, %v656_v39, %v296_v42  ;;  %v311_v31 = vsel %vm211_vm15, 1, %v580_v12 }
  0x96   :  { %v304_v36 = vrot.slane %v302_v26, 7 }
  0x98   :  { %564 = vset.pattern.permute.xlu0 %v573_v0 }
  0x9a   :  { %557 = vset.pattern.permute.xlu1 %v580_v12 }
  0x9b   :  { %554 = vset.pattern.permute.xlu2 %v579_v11  ;;  %75 = vperm.xlu1 %557, %v40_v22  }
  0x9c   :  { %56 = vperm.xlu2 %554, %v40_v22   ;;  %v681_v56 = vpop.permute.xlu1 %324  ;;  %v298_v57 = vpop.permute.xlu0 %297 }
  0x9d   :  { %v300_v28 = vsel %vm299_vm14, %v296_v42, %v298_v57  ;;  %v303_v39 = vsel %vm299_vm14, %v298_v57, %v658_v40  ;;  %v305_v42 = vrot.slane %v301_v30, 6  ;;  %v318_v40 = vsel %vm239_vm8, %v311_v31, %v675_v54 }
  0x9e   :  { %v306_v43 = vrot.slane %v300_v28, 5  ;;  %v307_v53 = vsel %vm239_vm8, %v303_v39, %v304_v36  ;;  %v348_v57 = vrot.slane %v345_v38, 7  ;;  %v335_v54 = vsel %vm332_vm2, %v681_v56, %v327_v7 }
  0xa0   :  { %v308_v59 = vsel %vm241_vm9, %v305_v42, %v306_v43 }
  0xa3   :  { %559 = vset.pattern.permute.xlu1 %v581_v18 }
  0xa4   :  { %558 = vset.pattern.permute.xlu2 %v580_v12  ;;  %117 = vperm.xlu1 %559, %v40_v22   ;;  %v331_v33 = vpop.permute.xlu1 %330  ;;  %v329_v34 = vpop.permute.xlu0 %328 }
  0xa5   :  { %79 = vperm.xlu2 %558, %v41_v20   ;;  %v336_v46 = vsel %vm332_vm2, %v331_v33, %v681_v56  ;;  %v333_v47 = vsel %vm332_vm2, %v329_v34, %v331_v33  ;;  %v334_v48 = vsel %vm332_vm2, %v327_v7, %v329_v34  ;;  %v12_v7 = vld [vmem:[%s982_s0] ss:$2 sm:$0xf] }
  0xa6   :  { %v339_v60 = vrot.slane %v336_v46, 5  ;;  %v338_v61 = vrot.slane %v333_v47, 6  ;;  %v337_v62 = vrot.slane %v334_v48, 7  ;;  %vm44_vm2 = vcmp.eq.s32.totalorder %v12_v7, 1 }
  0xa7   :  { %v45_v10 = vsel %vm44_vm2, 1, %v580_v12  ;;  %vm446_vm2 = vcmask 261120  }
  0xa8   :  { %v340_v29 = vsel %vm239_vm8, %v335_v54, %v337_v62  ;;  %v46_v16 = vperm.slane %v45_v10, 0 }
  0xac   :  { %562 = vset.pattern.permute.xlu1 %v582_v21  ;;  %v777_v6 = vpop.permute.xlu1 %381 }
  0xad   :  { %560 = vset.pattern.permute.xlu2 %v581_v18  ;;  %163 = vperm.xlu1 %562, %v41_v20   ;;  %v237_v18 = vrot.slane %v233_v4, 6 }
  0xae   :  { %121 = vperm.xlu2 %560, %v41_v20   ;;  %v271_v20 = vrot.slane %v268_v8, 7 }
  0xaf   :  { %v242_v27 = vsel %vm241_vm9, %v237_v18, %v238_v17  ;;  %v47_v17 = vperm.slane %v45_v10, 1  ;;  %v48_v18 = vperm.slane %v45_v10, 2 }
  0xb0   :  { %v274_v35 = vsel %vm239_vm8, %v269_v24, %v271_v20  ;;  %v244_v49 = vsel %vm243_vm12, %v240_v25, %v242_v27  ;;  %v49_v20 = vperm.slane %v45_v10, 3 }
  0xb1   :  { %vm245_vm4 = vcmp.ne.s32.totalorder %v613_v3, %v244_v49 }
  0xb2   :  { %vm762_vm7 = vmand %vm245_vm4, %vm256_vm3  ;;  %vm106_vm3 = vcmp.eq.s32.totalorder %v12_v7, 2 }
  0xb3   :  { %v107_v13 = vsel %vm106_vm3, 1, %v580_v12  ;;  %vm509_vm3 = vcmask 1043456  }
  0xb4   :  { %v110_v24 = vperm.slane %v107_v13, 2  ;;  %v111_v28 = vperm.slane %v107_v13, 3 }
  0xb6   :  { %561 = vset.pattern.permute.xlu2 %v582_v21  ;;  %v272_v21 = vrot.slane %v267_v9, 6 }
  0xb7   :  { %159 = vperm.xlu2 %561, %v40_v22   ;;  %v313_v22 = vsel %vm213_vm13, 1, %v580_v12 }
  0xb8   :  { %v316_v32 = vrot.slane %v313_v22, 6  ;;  %v275_v37 = vsel %vm241_vm9, %v272_v21, %v273_v19  ;;  %v378_v19 = vpop.permute.xlu0 %377  ;;  %v108_v21 = vperm.slane %v107_v13, 0  ;;  %v109_v22 = vperm.slane %v107_v13, 1 }
  0xba   :  { %v319_v50 = vsel %vm241_vm9, %v316_v32, %v678_v55  ;;  %v309_v55 = vsel %vm243_vm12, %v307_v53, %v308_v59 }
  0xbb   :  { %v320_v11 = vsel %vm243_vm12, %v318_v40, %v319_v50  ;;  %vm310_vm13 = vcmp.ne.s32.totalorder %v613_v3, %v309_v55 }
  0xbc   :  { %vm321_vm11 = vcmp.ne.s32.totalorder %v320_v11, 0 }
  0xbd   :  { %vm322_vm15 = vmand %vm310_vm13, %vm321_vm11  ;;  %vm812_vm11 = vcmp.eq.s32.totalorder %v108_v21, 1  ;;  %vm816_vm13 = vcmp.eq.s32.totalorder %v109_v22, 1 }
  0xbf   :  { %563 = vset.pattern.permute.xlu2 %v573_v0  ;;  %v283_v0 = vrot.slane %v280_v52, 6  ;;  %v276_v52 = vsel %vm243_vm12, %v274_v35, %v275_v37 }
  0xc0   :  { %vm277_vm6 = vcmp.ne.s32.totalorder %v613_v3, %v276_v52 }
  0xc1   :  { %v286_v23 = vsel %vm241_vm9, %v283_v0, %v284_v1  ;;  %v341_v0 = vsel %vm241_vm9, %v338_v61, %v339_v60  ;;  %v351_v1 = vsel %vm239_vm8, 1, %v348_v57 }
  0xc2   :  { %v287_v45 = vsel %vm243_vm12, %v285_v14, %v286_v23  ;;  %v353_v4 = vsel %vm243_vm12, %v351_v1, %v352_v2  ;;  %v342_v5 = vsel %vm243_vm12, %v340_v29, %v341_v0  ;;  %vm148_vm12 = vcmp.eq.s32.totalorder %v12_v7, 3 }
  0xc3   :  { %vm288_vm5 = vcmp.ne.s32.totalorder %v287_v45, 0  ;;  %vm354_vm0 = vcmp.ne.s32.totalorder %v353_v4, 0  ;;  %vm343_vm9 = vcmp.ne.s32.totalorder %v613_v3, %v342_v5  ;;  %v149_v14 = vsel %vm148_vm12, 1, %v580_v12 }
  0xc4   :  { %vm289_vm10 = vmand %vm277_vm6, %vm288_vm5  ;;  %v583_v3 = vmov 0.0   ;;  %v150_v26 = vperm.slane %v149_v14, 0  ;;  %v151_v23 = vperm.slane %v149_v14, 1  ;;  %v152_v25 = vperm.slane %v149_v14, 2 }
  0xc5   :  { %vm290_vm14 = vmor %vm762_vm7, %vm289_vm10  ;;  %v153_v12 = vperm.slane %v149_v14, 3  ;;  %vm794_vm5 = vcmp.eq.s32.totalorder %v46_v16, 1  ;;  %vm798_vm6 = vcmp.eq.s32.totalorder %v47_v17, 1  ;;  %vm802_vm7 = vcmp.eq.s32.totalorder %v48_v18, 1 }
  0xc6   :  { %vm323_vm8 = vmor %vm290_vm14, %vm322_vm15  ;;  %vm808_vm10 = vcmp.eq.s32.totalorder %v49_v20, 1  ;;  %vm820_vm14 = vcmp.eq.s32.totalorder %v110_v24, 1  ;;  %vm824_vm15 = vcmp.eq.s32.totalorder %v150_v26, 1 }
  0xc7   :  { %vm355_vm1 = vmand %vm343_vm9, %vm354_vm0  ;;  %vm828_vm0 = vcmp.eq.s32.totalorder %v151_v23, 1  ;;  %vm832_vm9 = vcmp.eq.s32.totalorder %v152_v25, 1 }
  0xc8   :  { %vm356_vm4 = vmor %vm323_vm8, %vm355_vm1  ;;  %vm836_vm8 = vcmp.eq.s32.totalorder %v111_v28, 1  ;;  %vm849_vm1 = vcmp.eq.s32.totalorder %v153_v12, 1 }
  0xc9   :  { %v525_v15 = vsel %vm356_vm4, 1.0, %v583_v3 }
  0xca   :  { %v788_v30 = vperm.slane %v525_v15, 0  ;;  %v790_v27 = vperm.slane %v525_v15, 1  ;;  %v792_v31 = vperm.slane %v525_v15, 2  ;;  %v806_v35 = vperm.slane %v525_v15, 3 }
  0xcc   :  { %v392_v60 = vmul.f32 %v378_v19, %v788_v30  ;;  %v393_v61 = vmul.f32 %v378_v19, %v790_v27  ;;  %v394_v62 = vmul.f32 %v378_v19, %v792_v31  ;;  %v396_v4 = vmul.f32 %v777_v6, %v788_v30 }
  0xcd   :  { %v397_v5 = vmul.f32 %v777_v6, %v790_v27  ;;  %v398_v7 = vmul.f32 %v777_v6, %v792_v31 }
  0xd1   :  { %v732_v41 = vpop.permute.xlu2 %66 }
  0xdb   :  { %v770_v56 = vpop.permute.xlu2 %87 }
  0xe4   :  { %v783_v8 = vpop.permute.xlu2 %129 }
  0xe9   :  { %v84_v9 = vpop.permute.xlu1 %83 }
  0xea   :  { %v98_v48 = vsel %vm794_vm5, %v732_v41, %v84_v9  ;;  %v99_v49 = vsel %vm798_vm6, %v732_v41, %v84_v9  ;;  %v100_v40 = vsel %vm802_vm7, %v732_v41, %v84_v9  ;;  %v101_v51 = vsel %vm808_vm10, %v732_v41, %v84_v9 }
  0xeb   :  { %v395_v41 = vmul.f32 %v378_v19, %v806_v35  ;;  %v399_v9 = vmul.f32 %v777_v6, %v806_v35 }
  0xed   :  { %v168_v42 = vpop.permute.xlu2 %167 }
  0xf1   :  { %v72_v58 = vpop.permute.xlu0 %71 }
  0xf2   :  { %v126_v43 = vpop.permute.xlu1 %125  ;;  %v102_v0 = vsel %vm794_vm5, %v72_v58, %v770_v56  ;;  %v103_v1 = vsel %vm798_vm6, %v72_v58, %v770_v56  ;;  %v104_v2 = vsel %vm802_vm7, %v72_v58, %v770_v56  ;;  %v105_v29 = vsel %vm808_vm10, %v72_v58, %v770_v56 }
  0xf3   :  { %v140_v52 = vsel %vm812_vm11, %v126_v43, %v98_v48  ;;  %v141_v53 = vsel %vm816_vm13, %v126_v43, %v99_v49  ;;  %v142_v57 = vsel %vm820_vm14, %v126_v43, %v100_v40  ;;  %v143_v59 = vsel %vm836_vm8, %v126_v43, %v101_v51 }
  0xf4   :  { %v182_v54 = vsel %vm824_vm15, %v168_v42, %v140_v52  ;;  %v183_v11 = vsel %vm828_vm0, %v168_v42, %v141_v53  ;;  %v184_v55 = vsel %vm832_vm9, %v168_v42, %v142_v57  ;;  %v185_v63 = vsel %vm849_vm1, %v168_v42, %v143_v59 }
  0xf5   :  { %v408_v10 = vadd.f32 %v392_v60, %v182_v54  ;;  %v409_v13 = vadd.f32 %v393_v61, %v183_v11  ;;  %v410_v14 = vadd.f32 %v394_v62, %v184_v55  ;;  %v411_v3 = vadd.f32 %v395_v41, %v185_v63  ;;  %v19_v60 = vld [vmem:[%s981_s1 + $0x20] sm:$0x7] }
  0xf6   :  { %v144_v56 = vsel %vm812_vm11, %v783_v8, %v102_v0  ;;  %v145_v16 = vsel %vm816_vm13, %v783_v8, %v103_v1  ;;  %v146_v17 = vsel %vm820_vm14, %v783_v8, %v104_v2  ;;  %v147_v6 = vsel %vm836_vm8, %v783_v8, %v105_v29  ;;  %v57_v18 = vpop.permute.xlu2 %56  ;;  %443 = vperm.xlu2 %563, %v19_v60  }
  0xf7   :  { %v424_v28 = vmax.f32 %v408_v10, 0.0  ;;  %v425_v12 = vmax.f32 %v409_v13, 0.0  ;;  %v426_v8 = vmax.f32 %v410_v14, 0.0  ;;  %v427_v42 = vmax.f32 %v411_v3, 0.0 }
  0xf9   :  { %v62_v62 = vpop.permute.xlu0 %61 }
  0xfb   :  { %v172_v15 = vpop.permute.xlu1 %171 }
  0xfc   :  { %v186_v19 = vsel %vm824_vm15, %v172_v15, %v144_v56  ;;  %v187_v20 = vsel %vm828_vm0, %v172_v15, %v145_v16  ;;  %v188_v21 = vsel %vm832_vm9, %v172_v15, %v146_v17  ;;  %v189_v22 = vsel %vm849_vm1, %v172_v15, %v147_v6 }
  0xfd   :  { %v412_v24 = vadd.f32 %v396_v4, %v186_v19  ;;  %v413_v26 = vadd.f32 %v397_v5, %v187_v20  ;;  %v414_v23 = vadd.f32 %v398_v7, %v188_v21  ;;  %v415_v25 = vadd.f32 %v399_v9, %v189_v22 }
  0xff   :  { %v428_v43 = vmax.f32 %v412_v24, 0.0  ;;  %v429_v48 = vmax.f32 %v413_v26, 0.0  ;;  %v430_v49 = vmax.f32 %v414_v23, 0.0  ;;  %v431_v40 = vmax.f32 %v415_v25, 0.0  ;;  %v80_v59 = vpop.permute.xlu2 %79 }
 0x100   :  { %v94_v7 = vsel %vm794_vm5, %v62_v62, %v80_v59  ;;  %v95_v9 = vsel %vm798_vm6, %v62_v62, %v80_v59  ;;  %v96_v10 = vsel %vm802_vm7, %v62_v62, %v80_v59  ;;  %v97_v13 = vsel %vm808_vm10, %v62_v62, %v80_v59 }
 0x101   :  { %v437_v51 = vpack.c.bf16 %v428_v43, %v424_v28  ;;  %v438_v52 = vpack.c.bf16 %v429_v48, %v425_v12  ;;  %v439_v53 = vpack.c.bf16 %v430_v49, %v426_v8  ;;  %v440_v57 = vpack.c.bf16 %v431_v40, %v427_v42 }
 0x102   :  { %v370_v5 = vpop.permute.xlu0 %369 }
 0x103   :  { %456 = vmatpush.bf16.msra.mxu0 %v437_v51  ;;  %469 = vmatpush.bf16.msra.mxu1 %v438_v52  ;;  %v384_v56 = vmul.f32 %v370_v5, %v788_v30  ;;  %v385_v34 = vmul.f32 %v370_v5, %v790_v27  ;;  %v386_v36 = vmul.f32 %v370_v5, %v792_v31 }
 0x104   :  { %482 = vmatpush.bf16.msra.mxu2 %v439_v53  ;;  %v374_v58 = vpop.permute.xlu1 %373  ;;  %495 = vmatpush.bf16.msra.mxu3 %v440_v57  ;;  %v387_v16 = vmul.f32 %v370_v5, %v806_v35  ;;  %v432_v57 = vpack.c.bf16 %v19_v60, %v19_v60 }
 0x105   :  { %v388_v17 = vmul.f32 %v374_v58, %v788_v30  ;;  %v389_v6 = vmul.f32 %v374_v58, %v790_v27  ;;  %v391_v19 = vmul.f32 %v374_v58, %v806_v35 }
 0x108   :  { %v122_v41 = vpop.permute.xlu2 %121 }
 0x109   :  { %v136_v23 = vsel %vm812_vm11, %v122_v41, %v94_v7  ;;  %v137_v25 = vsel %vm816_vm13, %v122_v41, %v95_v9  ;;  %v138_v30 = vsel %vm820_vm14, %v122_v41, %v96_v10  ;;  %v139_v27 = vsel %vm836_vm8, %v122_v41, %v97_v13 }
 0x10d   :  { %v76_v61 = vpop.permute.xlu1 %75 }
 0x10e   :  { %v90_v11 = vsel %vm794_vm5, %v57_v18, %v76_v61  ;;  %v91_v55 = vsel %vm798_vm6, %v57_v18, %v76_v61  ;;  %v92_v63 = vsel %vm802_vm7, %v57_v18, %v76_v61  ;;  %v93_v0 = vsel %vm808_vm10, %v57_v18, %v76_v61 }
 0x10f   :  { %v390_v18 = vmul.f32 %v374_v58, %v792_v31 }
 0x111   :  { %v160_v14 = vpop.permute.xlu2 %159 }
 0x116   :  { %v118_v54 = vpop.permute.xlu1 %117 }
 0x117   :  { %v132_v1 = vsel %vm812_vm11, %v118_v54, %v90_v11  ;;  %v133_v2 = vsel %vm816_vm13, %v118_v54, %v91_v55  ;;  %v134_v29 = vsel %vm820_vm14, %v118_v54, %v92_v63  ;;  %v135_v4 = vsel %vm836_vm8, %v118_v54, %v93_v0 }
 0x118   :  { %v174_v3 = vsel %vm824_vm15, %v160_v14, %v132_v1  ;;  %v175_v15 = vsel %vm828_vm0, %v160_v14, %v133_v2  ;;  %v176_v32 = vsel %vm832_vm9, %v160_v14, %v134_v29  ;;  %v177_v33 = vsel %vm849_vm1, %v160_v14, %v135_v4 }
 0x119   :  { %v400_v20 = vadd.f32 %v384_v56, %v174_v3  ;;  %v401_v21 = vadd.f32 %v385_v34, %v175_v15  ;;  %v402_v22 = vadd.f32 %v386_v36, %v176_v32  ;;  %v403_v24 = vadd.f32 %v387_v16, %v177_v33 }
 0x11b   :  { %v416_v42 = vmax.f32 %v400_v20, 0.0  ;;  %v417_v43 = vmax.f32 %v401_v21, 0.0  ;;  %v418_v47 = vmax.f32 %v402_v22, 0.0  ;;  %v419_v48 = vmax.f32 %v403_v24, 0.0 }
 0x11f   :  { %v164_v26 = vpop.permute.xlu1 %163 }
 0x120   :  { %v178_v31 = vsel %vm824_vm15, %v164_v26, %v136_v23  ;;  %v179_v35 = vsel %vm828_vm0, %v164_v26, %v137_v25  ;;  %v180_v28 = vsel %vm832_vm9, %v164_v26, %v138_v30  ;;  %v181_v37 = vsel %vm849_vm1, %v164_v26, %v139_v27 }
 0x121   :  { %v404_v38 = vadd.f32 %v388_v17, %v178_v31  ;;  %v405_v12 = vadd.f32 %v389_v6, %v179_v35  ;;  %v406_v8 = vadd.f32 %v390_v18, %v180_v28  ;;  %v407_v39 = vadd.f32 %v391_v19, %v181_v37 }
 0x123   :  { %v420_v49 = vmax.f32 %v404_v38, 0.0  ;;  %v421_v44 = vmax.f32 %v405_v12, 0.0  ;;  %v422_v40 = vmax.f32 %v406_v8, 0.0  ;;  %v423_v51 = vmax.f32 %v407_v39, 0.0 }
 0x125   :  { %v433_v45 = vpack.c.bf16 %v420_v49, %v416_v42  ;;  %v434_v52 = vpack.c.bf16 %v421_v44, %v417_v43  ;;  %v435_v53 = vpack.c.bf16 %v422_v40, %v418_v47  ;;  %v436_v46 = vpack.c.bf16 %v423_v51, %v419_v48 }
 0x127   :  { %457 = vmatpush.bf16.msra.mxu0 %v433_v45  ;;  %470 = vmatpush.bf16.msra.mxu1 %v434_v52 }
 0x128   :  { %483 = vmatpush.bf16.msra.mxu2 %v435_v53  ;;  %496 = vmatpush.bf16.msra.mxu3 %v436_v46 }
 0x12a   :  { %526 = vmatmul.msk.bf16.vlgmr.msra.gmra.mxu0 %vm446_vm2, %v432_v57  ;;  %527 = vmatmul.msk.bf16.vlgmr.msra.gmra.mxu1 %vm446_vm2, %v432_v57 }
 0x12b   :  { %528 = vmatmul.msk.bf16.vlgmr.msra.gmra.mxu2 %vm446_vm2, %v432_v57  ;;  %529 = vmatmul.msk.bf16.vlgmr.msra.gmra.mxu3 %vm446_vm2, %v432_v57 }
 0x150   :  { %v444_v50 = vpop.permute.xlu2 %443 }
 0x1a7   :  { %v459_v58 = vpop.f32.mrf.mxu0  ;;  %v472_v59 = vpop.f32.mrf.mxu1 }
 0x1a8   :  { %v460_v61 = vadd.f32 %v459_v58, %v444_v50  ;;  %v473_v62 = vadd.f32 %v472_v59, %v444_v50 }
 0x1aa   :  { %565 = vtanh.f32 %v460_v61 }
 0x1ab   :  { %567 = vtanh.f32 %v473_v62 }
 0x1ae   :  { %v485_v41 = vpop.f32.mrf.mxu2  ;;  %v498_v54 = vpop.f32.mrf.mxu3 }
 0x1af   :  { %v499_v11 = vadd.f32 %v498_v54, %v444_v50  ;;  %v461_v60 = vpop.f32.mrf.mxu0  ;;  %v474_v55 = vpop.f32.mrf.mxu1  ;;  %v486_v0 = vadd.f32 %v485_v41, %v444_v50 }
 0x1b0   :  { %v566_v63 = vpop.eup %565 }
 0x1b1   :  { %v568_v1 = vpop.eup %567  ;;  %569 = vtanh.f32 %v499_v11 }
 0x1b2   :  { %v508_v2 = vrot.slane %v568_v1, 4  ;;  %571 = vtanh.f32 %v486_v0 }
 0x1b4   :  { %v510_v29 = vsel %vm509_vm3, %v566_v63, %v508_v2 }
 0x1b5   :  { %512 = vst [vmem:[%s983_s2] sm:$0x77] %v510_v29 }
 0x1b6   :  { %v487_v4 = vpop.f32.mrf.mxu2  ;;  %v500_v5 = vpop.f32.mrf.mxu3 }
 0x1b7   :  { %v570_v7 = vpop.eup %569 }
 0x1b8   :  { %v515_v9 = vrot.slane %v570_v7, 4  ;;  %v572_v10 = vpop.eup %571 }
 0x1ba   :  { %v516_v13 = vsel %vm509_vm3, %v572_v10, %v515_v9 }
 0x1bb   :  { %530 = vst [vmem:[%s983_s2 + $0x8] sm:$0x77] %v516_v13 }

</bundles_post_ra>
